<compile_context>
chip_gen: v7x
topology: tpu7x:2x2x1
jax: 0.10.0
libtpu: 0.0.40
codegen_flags: <defaults>
</compile_context>

<pallas_src>
import functools

import jax
import jax.numpy as jnp
from jax.experimental import pallas as pl
from jax.experimental.pallas import tpu as pltpu

POOL = 10  # nn.AvgPool1d kernel size in the module


def _round_up(a, b):
    return (a + b - 1) // b * b


def _vmem_capacity_bytes():
    """Physical VMEM per TensorCore; conservative fallback = smallest part (v7x)."""
    try:
        return int(pltpu.get_tpu_info().vmem_capacity_bytes)
    except Exception:
        return 64 * 2**20


# --------------------------------------------------------------------------- #
# Kernel.  Grid = (batch tiles i, feature tiles j).
# --------------------------------------------------------------------------- #
def ffwop_kernel(xw_ref, w1_ref, b1_ref, wc1_ref, wc2_ref, bc_ref,
                 f1_ref, f2_ref, out_ref, *, cp_pad, pool):
    j = pl.program_id(1)

    x = xw_ref[...]                                            # (tm, 10*Cp_pad) bf16
    # Backbone GEMM (full K in one MXU call) + bias + ReLU, straight into f1.
    f1 = jnp.maximum(
        jnp.dot(x, w1_ref[...], preferred_element_type=jnp.float32) + b1_ref[...],
        0.0)
    f1_ref[...] = f1
    # Classifier contribution from this F tile (bf16 operands, f32 accumulation).
    partial = jnp.dot(f1.astype(jnp.bfloat16), wc1_ref[...],
                      preferred_element_type=jnp.float32)

    @pl.when(j == 0)
    def _():
        # AvgPool1d(10): the 10 windows are lane-aligned Cp_pad-wide chunks of
        # the already-loaded slab -> pure VPU adds, no extra HBM traffic.
        s = xw_ref[:, 0:cp_pad].astype(jnp.float32)
        for w in range(1, pool):
            s = s + xw_ref[:, w * cp_pad:(w + 1) * cp_pad].astype(jnp.float32)
        f2 = s * jnp.float32(1.0 / pool)
        f2_ref[...] = f2
        out_ref[...] = (partial + bc_ref[...]
                        + jnp.dot(f2.astype(jnp.bfloat16), wc2_ref[...],
                                  preferred_element_type=jnp.float32))

    @pl.when(j != 0)
    def _():
        # `out` block index is constant across j (innermost, 'arbitrary'), so the
        # block stays resident in VMEM and this read-modify-write accumulates.
        out_ref[...] = out_ref[...] + partial
    # TODO(synk): Dropout(p=0.4) is identity at inference; training-mode dropout
    # (pltpu.prng_random_bits mask) is intentionally not applied here.


# --------------------------------------------------------------------------- #
# Parameter preparation (off the hot path): permute/pad W1 into the collapsed
# window-major K layout, pad everything lane-dense, cast heavy streams to bf16.
# --------------------------------------------------------------------------- #
def prepare_params(params, in_channels, time_step):
    C, T = in_channels, time_step
    assert T % POOL == 0, "time_step must be divisible by the pool kernel (10)"
    Tp = T // POOL
    Cp = C * Tp
    w1 = params["w1"]
    F = w1.shape[1]
    NC = params["bc"].shape[-1]

    Cp_pad = _round_up(Cp, 128)
    NC_pad = _round_up(NC, 128)
    K = POOL * Cp_pad

    vmem_cap = _vmem_capacity_bytes()
    # Bigger F tiles on 128 MiB parts (v5e/v6e) keep nfn == 1 more often so the
    # activation slab is truly read once; cap lower on v7x (64 MiB VMEM).
    tn_cap = 512 if vmem_cap <= 80 * 2**20 else 1024
    F_pad = _round_up(F, 128)
    tn = F_pad if F_pad <= tn_cap else tn_cap
    F_pad = _round_up(F_pad, tn)

    # W1 row (w*Cp_pad + c*Tp + tp) multiplies x[b, c, tp*10 + w].
    w1p = w1.reshape(C, Tp, POOL, F).transpose(2, 0, 1, 3).reshape(POOL, Cp, F)
    w1p = jnp.pad(w1p, ((0, 0), (0, Cp_pad - Cp), (0, F_pad - F)))
    w1p = w1p.reshape(K, F_pad).astype(jnp.bfloat16)

    b1 = jnp.pad(params["b1"].reshape(1, F), ((0, 0), (0, F_pad - F)))
    wc1 = jnp.pad(params["wc1"],
                  ((0, F_pad - F), (0, NC_pad - NC))).astype(jnp.bfloat16)
    wc2 = jnp.pad(params["wc2"],
                  ((0, Cp_pad - Cp), (0, NC_pad - NC))).astype(jnp.bfloat16)
    bc = jnp.pad(params["bc"].reshape(1, NC), ((0, 0), (0, NC_pad - NC)))

    prepped = {"w1p": w1p, "b1": b1, "wc1": wc1, "wc2": wc2, "bc": bc}
    meta = {"C": C, "T": T, "Tp": Tp, "Cp": Cp, "F": F, "NC": NC, "K": K,
            "Cp_pad": Cp_pad, "F_pad": F_pad, "NC_pad": NC_pad, "tn": tn,
            "vmem_cap": vmem_cap}
    return prepped, meta


def _working_set_bytes(tm, tn, K, Cp_pad, NC_pad):
    return (2 * (tm * K + K * tn) * 2                      # bf16 x / W1, double-buffered
            + 2 * (tn * NC_pad * 2 + tn * 4)               # Wc1 (bf16) + b1 (f32) blocks
            + 2 * (Cp_pad * NC_pad * 2 + NC_pad * 4)       # Wc2 / bc blocks
            + 2 * (tm * tn + tm * Cp_pad + tm * NC_pad) * 4)  # f32 output blocks


# --------------------------------------------------------------------------- #
# Forward
# --------------------------------------------------------------------------- #
def ffwop_forward(x, prepped, meta):
    """x: (B, C, T) or (B, 1, C, T) float32.  Returns (f1, f2, out)."""
    if x.ndim > 3:
        x = jnp.squeeze(x, axis=1)
    B, C, T = x.shape
    assert C == meta["C"] and T == meta["T"]
    Tp, Cp, K = meta["Tp"], meta["Cp"], meta["K"]
    Cp_pad, F_pad, NC_pad, tn = (meta["Cp_pad"], meta["F_pad"],
                                 meta["NC_pad"], meta["tn"])
    F, NC = meta["F"], meta["NC"]
    vmem_cap = meta["vmem_cap"]

    # Batch tile: as large as the VMEM budget allows (W1-bandwidth-bound kernel,
    # bigger tm cuts W1 re-streams); small batches round to 16 (bf16 packing).
    budget = int(0.55 * vmem_cap)
    tm = 16
    for cand in (2048, 1024, 512, 256, 128, 64, 32, 16):
        if _working_set_bytes(cand, tn, K, Cp_pad, NC_pad) <= budget:
            tm = cand
            break
    tm = min(tm, max(16, _round_up(B, 16)))
    B_pad = _round_up(B, tm)
    nbm, nfn = B_pad // tm, F_pad // tn

    # Single activation layout pass:
    #   xw[b, w*Cp_pad + c*Tp + tp] = x[b, c, tp*10 + w]
    # (each pool window occupies a lane-aligned 128-multiple chunk).
    xw = x.reshape(B, C, Tp, POOL).transpose(0, 3, 1, 2).reshape(B, POOL, Cp)
    xw = jnp.pad(xw, ((0, B_pad - B), (0, 0), (0, Cp_pad - Cp)))
    xw = xw.reshape(B_pad, K).astype(jnp.bfloat16)

    flops = 2 * B_pad * K * F_pad + 2 * B_pad * (F_pad + Cp_pad) * NC_pad
    bytes_accessed = (xw.size * 2 + prepped["w1p"].size * 2 * nbm
                      + (prepped["wc1"].size + prepped["wc2"].size) * 2
                      + (prepped["b1"].size + prepped["bc"].size) * 4
                      + (B_pad * F_pad + B_pad * Cp_pad + B_pad * NC_pad) * 4)
    ws = _working_set_bytes(tm, tn, K, Cp_pad, NC_pad)
    vmem_limit = int(min(max(2 * ws, 32 * 2**20), int(0.75 * vmem_cap)))

    kernel = functools.partial(ffwop_kernel, cp_pad=Cp_pad, pool=POOL)

    f1p, f2p, outp = pl.pallas_call(
        kernel,
        grid=(nbm, nfn),
        in_specs=[
            pl.BlockSpec((tm, K),          lambda i, j: (i, 0)),   # xw (resident in j)
            pl.BlockSpec((K, tn),          lambda i, j: (0, j)),   # W1 (permuted, bf16)
            pl.BlockSpec((1, tn),          lambda i, j: (0, j)),   # b1
            pl.BlockSpec((tn, NC_pad),     lambda i, j: (j, 0)),   # Wc1 (bf16)
            pl.BlockSpec((Cp_pad, NC_pad), lambda i, j: (0, 0)),   # Wc2 (bf16)
            pl.BlockSpec((1, NC_pad),      lambda i, j: (0, 0)),   # bc
        ],
        out_specs=(
            pl.BlockSpec((tm, tn),         lambda i, j: (i, j)),   # f1
            pl.BlockSpec((tm, Cp_pad),     lambda i, j: (i, 0)),   # f2 (resident in j)
            pl.BlockSpec((tm, NC_pad),     lambda i, j: (i, 0)),   # out (resident in j)
        ),
        out_shape=(
            jax.ShapeDtypeStruct((B_pad, F_pad), jnp.float32),
            jax.ShapeDtypeStruct((B_pad, Cp_pad), jnp.float32),
            jax.ShapeDtypeStruct((B_pad, NC_pad), jnp.float32),
        ),
        compiler_params=pltpu.CompilerParams(
            dimension_semantics=("parallel", "arbitrary"),
            vmem_limit_bytes=vmem_limit,
        ),
        cost_estimate=pl.CostEstimate(
            flops=flops, transcendentals=0, bytes_accessed=bytes_accessed),
    )(xw, prepped["w1p"], prepped["b1"], prepped["wc1"], prepped["wc2"],
      prepped["bc"])

    # Slice the lane-dense padded outputs back to logical shapes.
    return f1p[:B, :F], f2p[:B, :Cp], outp[:B, :NC]


# --------------------------------------------------------------------------- #
# Parameters + pure-JAX reference (matching bf16-stream / f32-accumulate numerics)
# --------------------------------------------------------------------------- #
def init_params(key, in_channels, time_step, feature_dim, num_classes):
    C, T, F = in_channels, time_step, feature_dim
    Tp = T // POOL
    k1, k2, k3, k4 = jax.random.split(key, 4)
    w1 = jax.random.normal(k1, (C * T, F), jnp.float32) * 0.05
    b1 = jax.random.normal(k2, (1, F), jnp.float32) * 0.01
    wc = jax.random.normal(k3, (F + C * Tp, num_classes), jnp.float32) * 0.05
    bc = jax.random.normal(k4, (1, num_classes), jnp.float32) * 0.01
    return {"w1": w1, "b1": b1,
            "wc1": wc[:F, :], "wc2": wc[F:, :],   # row-split of the fused classifier
            "bc": bc}


def ffwop_reference(x, params):
    if x.ndim > 3:
        x = jnp.squeeze(x, axis=1)
    B, C, T = x.shape
    Tp = T // POOL
    xb = x.astype(jnp.bfloat16)
    f1 = jnp.maximum(
        jnp.dot(xb.reshape(B, C * T), params["w1"].astype(jnp.bfloat16),
                preferred_element_type=jnp.float32) + params["b1"], 0.0)
    f2 = xb.astype(jnp.float32).reshape(B, C, Tp, POOL).mean(axis=-1).reshape(B, C * Tp)
    out = (jnp.dot(f1.astype(jnp.bfloat16), params["wc1"].astype(jnp.bfloat16),
                   preferred_element_type=jnp.float32)
           + jnp.dot(f2.astype(jnp.bfloat16), params["wc2"].astype(jnp.bfloat16),
                     preferred_element_type=jnp.float32)
           + params["bc"])
    return f1, f2, out


if __name__ == "__main__":
    B, C, T = 2, 4, 20          # batch, in_channels, time_step (divisible by 10)
    F, NC = 32, 3               # backbone feature_dim, num_classes

    key = jax.random.PRNGKey(0)
    kx, kp = jax.random.split(key)
    x = jax.random.normal(kx, (B, 1, C, T), jnp.float32)   # 4-D input, squeezed inside
    params = init_params(kp, C, T, F, NC)
    prepped, meta = prepare_params(params, C, T)

    f1, f2, out = jax.block_until_ready(ffwop_forward(x, prepped, meta))

    r1, r2, rout = ffwop_reference(x, params)
    assert jnp.allclose(f1, r1, atol=5e-3, rtol=5e-3), float(jnp.max(jnp.abs(f1 - r1)))
    assert jnp.allclose(f2, r2, atol=5e-3, rtol=5e-3), float(jnp.max(jnp.abs(f2 - r2)))
    assert jnp.allclose(out, rout, atol=2e-2, rtol=2e-2), float(jnp.max(jnp.abs(out - rout)))

    print("KERNEL_OK")
</pallas_src>

<mosaic_0001>
module attributes {stable_mosaic.version = 11 : i64} {
  func.func @ffwop_kernel(%arg0: i32, %arg1: i32, %arg2: memref<16x1280xbf16, #tpu.memory_space<vmem>>, %arg3: memref<1280x128xbf16, #tpu.memory_space<vmem>>, %arg4: memref<1x128xf32, #tpu.memory_space<vmem>>, %arg5: memref<128x128xbf16, #tpu.memory_space<vmem>>, %arg6: memref<128x128xbf16, #tpu.memory_space<vmem>>, %arg7: memref<1x128xf32, #tpu.memory_space<vmem>>, %arg8: memref<16x128xf32, #tpu.memory_space<vmem>>, %arg9: memref<16x128xf32, #tpu.memory_space<vmem>>, %arg10: memref<16x128xf32, #tpu.memory_space<vmem>>) attributes {dimension_semantics = [#tpu.dimension_semantics<parallel>, #tpu.dimension_semantics<arbitrary>], iteration_bounds = array<i64: 1, 1>, scalar_prefetch = 0 : i64, scratch_operands = 0 : i64, tpu.core_type = #tpu.core_type<tc>, window_params = [{transform_indices = @transform_0, window_bounds = array<i64: 16, 1280>}, {transform_indices = @transform_1, window_bounds = array<i64: 1280, 128>}, {transform_indices = @transform_2, window_bounds = array<i64: 1, 128>}, {transform_indices = @transform_3, window_bounds = array<i64: 128, 128>}, {pipeline_mode = #tpu.pipeline_mode<synchronous>, transform_indices = @transform_4, window_bounds = array<i64: 128, 128>}, {pipeline_mode = #tpu.pipeline_mode<synchronous>, transform_indices = @transform_5, window_bounds = array<i64: 1, 128>}, {transform_indices = @transform_6, window_bounds = array<i64: 16, 128>}, {transform_indices = @transform_7, window_bounds = array<i64: 16, 128>}, {transform_indices = @transform_8, window_bounds = array<i64: 16, 128>}]} {
    %c0 = arith.constant 0 : index
    %c0_0 = arith.constant 0 : index
    %0 = vector.load %arg2[%c0, %c0_0] : memref<16x1280xbf16, #tpu.memory_space<vmem>>, vector<16x1280xbf16>
    %c0_1 = arith.constant 0 : index
    %c0_2 = arith.constant 0 : index
    %1 = vector.load %arg3[%c0_1, %c0_2] : memref<1280x128xbf16, #tpu.memory_space<vmem>>, vector<1280x128xbf16>
    %cst = arith.constant dense<0.000000e+00> : vector<16x128xf32>
    %2 = tpu.matmul %0, %1, %cst {dimension_numbers = #tpu.dot_dimension_numbers<[1], [0], [0], [1], [0, 0, 1, 1], [], []>} : vector<16x1280xbf16>, vector<1280x128xbf16>, vector<16x128xf32> -> vector<16x128xf32>
    %c0_3 = arith.constant 0 : index
    %c0_4 = arith.constant 0 : index
    %3 = vector.load %arg4[%c0_3, %c0_4] : memref<1x128xf32, #tpu.memory_space<vmem>>, vector<1x128xf32>
    %4 = vector.broadcast %3 : vector<1x128xf32> to vector<16x128xf32>
    %5 = arith.addf %2, %4 : vector<16x128xf32>
    %cst_5 = arith.constant 0.000000e+00 : f32
    %6 = vector.broadcast %cst_5 : f32 to vector<16x128xf32>
    %7 = arith.maximumf %5, %6 : vector<16x128xf32>
    %c0_6 = arith.constant 0 : index
    %c0_7 = arith.constant 0 : index
    %8 = vector.load %arg8[%c0_6, %c0_7] : memref<16x128xf32, #tpu.memory_space<vmem>>, vector<16x128xf32>
    tpu.vector_store %arg8[%c0_6, %c0_7], %7 {strides = array<i32>} : memref<16x128xf32, #tpu.memory_space<vmem>>, vector<16x128xf32>,
    %9 = arith.truncf %7 : vector<16x128xf32> to vector<16x128xbf16>
    %c0_8 = arith.constant 0 : index
    %c0_9 = arith.constant 0 : index
    %10 = vector.load %arg5[%c0_8, %c0_9] : memref<128x128xbf16, #tpu.memory_space<vmem>>, vector<128x128xbf16>
    %cst_10 = arith.constant dense<0.000000e+00> : vector<16x128xf32>
    %11 = tpu.matmul %9, %10, %cst_10 {dimension_numbers = #tpu.dot_dimension_numbers<[1], [0], [0], [1], [0, 0, 1, 1], [], []>} : vector<16x128xbf16>, vector<128x128xbf16>, vector<16x128xf32> -> vector<16x128xf32>
    %c0_i32 = arith.constant 0 : i32
    %12 = arith.cmpi eq, %arg1, %c0_i32 : i32
    %13 = arith.extui %12 : i1 to i32
    %c0_i32_11 = arith.constant 0 : i32
    %14 = arith.cmpi ne, %13, %c0_i32_11 : i32
    scf.if %14 {
      %c0_14 = arith.constant 0 : index
      %c0_15 = arith.constant 0 : index
      %18 = vector.load %arg2[%c0_14, %c0_15] : memref<16x1280xbf16, #tpu.memory_space<vmem>>, vector<16x128xbf16>
      %19 = arith.extf %18 : vector<16x128xbf16> to vector<16x128xf32>
      %c0_16 = arith.constant 0 : index
      %c128 = arith.constant 128 : index
      %20 = vector.load %arg2[%c0_16, %c128] : memref<16x1280xbf16, #tpu.memory_space<vmem>>, vector<16x128xbf16>
      %21 = arith.extf %20 : vector<16x128xbf16> to vector<16x128xf32>
      %22 = arith.addf %19, %21 : vector<16x128xf32>
      %c0_17 = arith.constant 0 : index
      %c256 = arith.constant 256 : index
      %23 = vector.load %arg2[%c0_17, %c256] : memref<16x1280xbf16, #tpu.memory_space<vmem>>, vector<16x128xbf16>
      %24 = arith.extf %23 : vector<16x128xbf16> to vector<16x128xf32>
      %25 = arith.addf %22, %24 : vector<16x128xf32>
      %c0_18 = arith.constant 0 : index
      %c384 = arith.constant 384 : index
      %26 = vector.load %arg2[%c0_18, %c384] : memref<16x1280xbf16, #tpu.memory_space<vmem>>, vector<16x128xbf16>
      %27 = arith.extf %26 : vector<16x128xbf16> to vector<16x128xf32>
      %28 = arith.addf %25, %27 : vector<16x128xf32>
      %c0_19 = arith.constant 0 : index
      %c512 = arith.constant 512 : index
      %29 = vector.load %arg2[%c0_19, %c512] : memref<16x1280xbf16, #tpu.memory_space<vmem>>, vector<16x128xbf16>
      %30 = arith.extf %29 : vector<16x128xbf16> to vector<16x128xf32>
      %31 = arith.addf %28, %30 : vector<16x128xf32>
      %c0_20 = arith.constant 0 : index
      %c640 = arith.constant 640 : index
      %32 = vector.load %arg2[%c0_20, %c640] : memref<16x1280xbf16, #tpu.memory_space<vmem>>, vector<16x128xbf16>
      %33 = arith.extf %32 : vector<16x128xbf16> to vector<16x128xf32>
      %34 = arith.addf %31, %33 : vector<16x128xf32>
      %c0_21 = arith.constant 0 : index
      %c768 = arith.constant 768 : index
      %35 = vector.load %arg2[%c0_21, %c768] : memref<16x1280xbf16, #tpu.memory_space<vmem>>, vector<16x128xbf16>
      %36 = arith.extf %35 : vector<16x128xbf16> to vector<16x128xf32>
      %37 = arith.addf %34, %36 : vector<16x128xf32>
      %c0_22 = arith.constant 0 : index
      %c896 = arith.constant 896 : index
      %38 = vector.load %arg2[%c0_22, %c896] : memref<16x1280xbf16, #tpu.memory_space<vmem>>, vector<16x128xbf16>
      %39 = arith.extf %38 : vector<16x128xbf16> to vector<16x128xf32>
      %40 = arith.addf %37, %39 : vector<16x128xf32>
      %c0_23 = arith.constant 0 : index
      %c1024 = arith.constant 1024 : index
      %41 = vector.load %arg2[%c0_23, %c1024] : memref<16x1280xbf16, #tpu.memory_space<vmem>>, vector<16x128xbf16>
      %42 = arith.extf %41 : vector<16x128xbf16> to vector<16x128xf32>
      %43 = arith.addf %40, %42 : vector<16x128xf32>
      %c0_24 = arith.constant 0 : index
      %c1152 = arith.constant 1152 : index
      %44 = vector.load %arg2[%c0_24, %c1152] : memref<16x1280xbf16, #tpu.memory_space<vmem>>, vector<16x128xbf16>
      %45 = arith.extf %44 : vector<16x128xbf16> to vector<16x128xf32>
      %46 = arith.addf %43, %45 : vector<16x128xf32>
      %cst_25 = arith.constant 1.000000e-01 : f32
      %47 = vector.broadcast %cst_25 : f32 to vector<16x128xf32>
      %48 = arith.mulf %46, %47 : vector<16x128xf32>
      %c0_26 = arith.constant 0 : index
      %c0_27 = arith.constant 0 : index
      %49 = vector.load %arg9[%c0_26, %c0_27] : memref<16x128xf32, #tpu.memory_space<vmem>>, vector<16x128xf32>
      tpu.vector_store %arg9[%c0_26, %c0_27], %48 {strides = array<i32>} : memref<16x128xf32, #tpu.memory_space<vmem>>, vector<16x128xf32>,
      %c0_28 = arith.constant 0 : index
      %c0_29 = arith.constant 0 : index
      %50 = vector.load %arg7[%c0_28, %c0_29] : memref<1x128xf32, #tpu.memory_space<vmem>>, vector<1x128xf32>
      %51 = vector.broadcast %50 : vector<1x128xf32> to vector<16x128xf32>
      %52 = arith.addf %11, %51 : vector<16x128xf32>
      %53 = arith.truncf %48 : vector<16x128xf32> to vector<16x128xbf16>
      %c0_30 = arith.constant 0 : index
      %c0_31 = arith.constant 0 : index
      %54 = vector.load %arg6[%c0_30, %c0_31] : memref<128x128xbf16, #tpu.memory_space<vmem>>, vector<128x128xbf16>
      %cst_32 = arith.constant dense<0.000000e+00> : vector<16x128xf32>
      %55 = tpu.matmul %53, %54, %cst_32 {dimension_numbers = #tpu.dot_dimension_numbers<[1], [0], [0], [1], [0, 0, 1, 1], [], []>} : vector<16x128xbf16>, vector<128x128xbf16>, vector<16x128xf32> -> vector<16x128xf32>
      %56 = arith.addf %52, %55 : vector<16x128xf32>
      %c0_33 = arith.constant 0 : index
      %c0_34 = arith.constant 0 : index
      %57 = vector.load %arg10[%c0_33, %c0_34] : memref<16x128xf32, #tpu.memory_space<vmem>>, vector<16x128xf32>
      tpu.vector_store %arg10[%c0_33, %c0_34], %56 {strides = array<i32>} : memref<16x128xf32, #tpu.memory_space<vmem>>, vector<16x128xf32>,
    } else {
    }
    %c0_i32_12 = arith.constant 0 : i32
    %15 = arith.cmpi ne, %arg1, %c0_i32_12 : i32
    %16 = arith.extui %15 : i1 to i32
    %c0_i32_13 = arith.constant 0 : i32
    %17 = arith.cmpi ne, %16, %c0_i32_13 : i32
    scf.if %17 {
      %c0_14 = arith.constant 0 : index
      %c0_15 = arith.constant 0 : index
      %18 = vector.load %arg10[%c0_14, %c0_15] : memref<16x128xf32, #tpu.memory_space<vmem>>, vector<16x128xf32>
      %19 = arith.addf %18, %11 : vector<16x128xf32>
      %c0_16 = arith.constant 0 : index
      %c0_17 = arith.constant 0 : index
      %20 = vector.load %arg10[%c0_16, %c0_17] : memref<16x128xf32, #tpu.memory_space<vmem>>, vector<16x128xf32>
      tpu.vector_store %arg10[%c0_16, %c0_17], %19 {strides = array<i32>} : memref<16x128xf32, #tpu.memory_space<vmem>>, vector<16x128xf32>,
    } else {
    }
    return
  }
  func.func @transform_0(%arg0: i32, %arg1: i32) -> (i32, i32) {
    %c0_i32 = arith.constant 0 : i32
    %c0_i32_0 = arith.constant 0 : i32
    return %arg0, %c0_i32 : i32, i32
  }
  func.func @transform_1(%arg0: i32, %arg1: i32) -> (i32, i32) {
    %c0_i32 = arith.constant 0 : i32
    %c0_i32_0 = arith.constant 0 : i32
    return %c0_i32, %arg1 : i32, i32
  }
  func.func @transform_2(%arg0: i32, %arg1: i32) -> (i32, i32) {
    %c0_i32 = arith.constant 0 : i32
    %c0_i32_0 = arith.constant 0 : i32
    return %c0_i32, %arg1 : i32, i32
  }
  func.func @transform_3(%arg0: i32, %arg1: i32) -> (i32, i32) {
    %c0_i32 = arith.constant 0 : i32
    %c0_i32_0 = arith.constant 0 : i32
    return %arg1, %c0_i32 : i32, i32
  }
  func.func @transform_4(%arg0: i32, %arg1: i32) -> (i32, i32) {
    %c0_i32 = arith.constant 0 : i32
    %c0_i32_0 = arith.constant 0 : i32
    %c0_i32_1 = arith.constant 0 : i32
    return %c0_i32, %c0_i32_0 : i32, i32
  }
  func.func @transform_5(%arg0: i32, %arg1: i32) -> (i32, i32) {
    %c0_i32 = arith.constant 0 : i32
    %c0_i32_0 = arith.constant 0 : i32
    %c0_i32_1 = arith.constant 0 : i32
    return %c0_i32, %c0_i32_0 : i32, i32
  }
  func.func @transform_6(%arg0: i32, %arg1: i32) -> (i32, i32) {
    %c0_i32 = arith.constant 0 : i32
    return %arg0, %arg1 : i32, i32
  }
  func.func @transform_7(%arg0: i32, %arg1: i32) -> (i32, i32) {
    %c0_i32 = arith.constant 0 : i32
    %c0_i32_0 = arith.constant 0 : i32
    return %arg0, %c0_i32 : i32, i32
  }
  func.func @transform_8(%arg0: i32, %arg1: i32) -> (i32, i32) {
    %c0_i32 = arith.constant 0 : i32
    %c0_i32_0 = arith.constant 0 : i32
    return %arg0, %c0_i32 : i32, i32
  }
}

</mosaic_0001>

<bundles_post_ra>
// kernel: tpu_custom_call.1
= control target key start
LH: loop header
LB: loop body
LE: loop exit
PB: predicated region body
PF: predicated region fallthrough
CT: control target
= control target key end

     0   :  { %14 = vsyncpa [#allocation3], 0  ;;  %s2149_s0 = inlined_call_operand.hbm [shape: bf16[16,1280], index: 0, kind: input, shape index: {}]   ;;  %s2150_s1 = inlined_call_operand.hbm [shape: bf16[1280,128], index: 1, kind: input, shape index: {}]   ;;  %s2151_s2 = inlined_call_operand.vmem [shape: f32[1,128], index: 2, kind: input, shape index: {}]   ;;  %s2152_s3 = inlined_call_operand.hbm [shape: bf16[128,128], index: 3, kind: input, shape index: {}]   ;;  %s2153_s4 = inlined_call_operand.hbm [shape: bf16[128,128], index: 4, kind: input, shape index: {}]   ;;  %s2154_s5 = inlined_call_operand.vmem [shape: f32[1,128], index: 5, kind: input, shape index: {}]   ;;  %s2155_s6 = inlined_call_operand.hbm [shape: f32[16,128], index: 6, kind: output, shape index: {0}]   ;;  %s2156_s7 = inlined_call_operand.hbm [shape: f32[16,128], index: 7, kind: output, shape index: {1}]   ;;  %s2157_s8 = inlined_call_operand.hbm [shape: f32[16,128], index: 8, kind: output, shape index: {2}]  }
   0x1   :  { %15 = vsyncpa [#allocation6], 0 }
   0x2   :  { %16 = vsyncpa [#allocation9], 0 }
   0x3   :  { %17 = vsyncpa [#allocation4], 0 }
   0x4   :  { %18 = vsyncpa [#allocation12], 0  ;;  %s1931_s27 = smov [#allocation5]   ;;  %s1767_s9 = scalar_lea.hbm %s2150_s1, 10240 }
   0x5   :  { %s36_s28 = sshll.u32 %s1931_s27, 4  ;;  %p1768_p0 = scmp.ne.s32.totalorder %s2150_s1, %s1767_s9  ;;  %s37_s28 = int_to_ptr.vmem [resolvable:$true] %s36_s28 }
   0x6   :  { %p1771_p1 = scmp.lt.u32.totalorder %s1767_s9, %s2150_s1 }
   0x8   :  { %p1773_p2 = pnand %p1771_p1, %p1768_p0 }
   0xa   :  { %1776 = shalt.err (!%p1773_p2)
}
   0xb   :  { %s1777_s14 = scalar_lea.vmem %s37_s28, 10240  ;;  %p1782_p4 = scmp.lt.s32.totalorder %s37_s28, %s37_s28 }
   0xc   :  { %p1778_p3 = scmp.ne.s32.totalorder %s37_s28, %s1777_s14  ;;  %p1783_p5 = scmp.lt.s32.totalorder %s1777_s14, %s1777_s14 }
   0xe   :  { %p1784_p6 = por %p1783_p5, %p1782_p4 }
  0x10   :  { %p1785_p7 = pnand %p1784_p6, %p1778_p3 }
  0x12   :  { %1788 = shalt.err (!%p1785_p7)
}
  0x13   :  { %s1932_s15 = smov 64   ;;  %s1933_s16 = smov 4  }
  0x14   :  { %42 = dma.hbm_to_vmem [thread:$0]  %s2150_s1, 10240, %s37_s28, [#allocation6], %s1932_s15, %s1932_s15, %s1933_s16  }
  0x15   :  { %s1934_s19 = smov [#allocation2]   ;;  %s1789_s23 = scalar_lea.hbm %s2149_s0, 1280 }
  0x16   :  { %s24_s20 = sshll.u32 %s1934_s19, 4  ;;  %p1790_p8 = scmp.ne.s32.totalorder %s2149_s0, %s1789_s23  ;;  %s25_s20 = int_to_ptr.vmem [resolvable:$true] %s24_s20 }
  0x17   :  { %p1793_p9 = scmp.lt.u32.totalorder %s1789_s23, %s2149_s0 }
  0x19   :  { %p1795_p10 = pnand %p1793_p9, %p1790_p8 }
  0x1b   :  { %1798 = shalt.err (!%p1795_p10)
}
  0x1c   :  { %s1799_s29 = scalar_lea.vmem %s25_s20, 1280  ;;  %p1804_p12 = scmp.lt.s32.totalorder %s25_s20, %s25_s20 }
  0x1d   :  { %p1800_p11 = scmp.ne.s32.totalorder %s25_s20, %s1799_s29  ;;  %p1805_p13 = scmp.lt.s32.totalorder %s1799_s29, %s1799_s29 }
  0x1f   :  { %p1806_p0 = por %p1805_p13, %p1804_p12 }
  0x21   :  { %p1807_p1 = pnand %p1806_p0, %p1800_p11 }
  0x23   :  { %1810 = shalt.err (!%p1807_p1)
}
  0x24   :  { %s1935_s1 = smov 640   ;;  %s1936_s28 = smov 40  }
  0x25   :  { %30 = dma.hbm_to_vmem [thread:$0]  %s2149_s0, 1280, %s25_s20, [#allocation3], %s1935_s1, %s1935_s1, %s1936_s28  }
  0x26   :  { %s1937_s10 = smov [#allocation7]   ;;  %s1938_s12 = smov [#allocation8]  }
  0x27   :  { %s50_s11 = sshll.u32 %s1937_s10, 4  ;;  %s62_s13 = sshll.u32 %s1938_s12, 4  ;;  %s51_s11 = int_to_ptr.vmem [resolvable:$true] %s50_s11  ;;  %s2018_s13 = int_to_ptr.vmem [resolvable:$true] %s62_s13 }
  0x28   :  { %s1811_s18 = scalar_lea.hbm %s2152_s3, 1024 }
  0x29   :  { %p1812_p2 = scmp.ne.s32.totalorder %s2152_s3, %s1811_s18  ;;  %p1815_p3 = scmp.lt.u32.totalorder %s1811_s18, %s2152_s3 }
  0x2b   :  { %p1817_p4 = pnand %p1815_p3, %p1812_p2 }
  0x2d   :  { %1820 = shalt.err (!%p1817_p4)
}
  0x2e   :  { %s1821_s0 = scalar_lea.vmem %s51_s11, 1024  ;;  %p1826_p6 = scmp.lt.s32.totalorder %s51_s11, %s51_s11 }
  0x2f   :  { %p1822_p5 = scmp.ne.s32.totalorder %s51_s11, %s1821_s0  ;;  %p1827_p7 = scmp.lt.s32.totalorder %s1821_s0, %s1821_s0 }
  0x31   :  { %p1828_p8 = por %p1827_p7, %p1826_p6 }
  0x33   :  { %p1829_p9 = pnand %p1828_p8, %p1822_p5 }
  0x35   :  { %1832 = shalt.err (!%p1829_p9)
}
  0x36   :  { %56 = dma.hbm_to_vmem [thread:$0]  %s2152_s3, 1024, %s51_s11, [#allocation6], %s1932_s15, %s1932_s15, %s1933_s16  }
  0x37   :  { %s1833_s27 = scalar_lea.hbm %s2153_s4, 1024 }
  0x38   :  { %p1834_p10 = scmp.ne.s32.totalorder %s2153_s4, %s1833_s27  ;;  %p1837_p11 = scmp.lt.u32.totalorder %s1833_s27, %s2153_s4 }
  0x3a   :  { %p1839_p12 = pnand %p1837_p11, %p1834_p10 }
  0x3c   :  { %1842 = shalt.err (!%p1839_p12)
}
  0x3d   :  { %s1843_s9 = scalar_lea.vmem %s2018_s13, 1024  ;;  %p1848_p0 = scmp.lt.s32.totalorder %s2018_s13, %s2018_s13 }
  0x3e   :  { %p1844_p13 = scmp.ne.s32.totalorder %s2018_s13, %s1843_s9  ;;  %p1849_p1 = scmp.lt.s32.totalorder %s1843_s9, %s1843_s9 }
  0x40   :  { %p1850_p2 = por %p1849_p1, %p1848_p0 }
  0x42   :  { %p1851_p3 = pnand %p1850_p2, %p1844_p13 }
  0x44   :  { %1854 = shalt.err (!%p1851_p3)
}
  0x45   :  { %68 = dma.hbm_to_vmem [thread:$0]  %s2153_s4, 1024, %s2018_s13, [#allocation9], %s1932_s15, %s1932_s15, %s1933_s16  }
  0x46   :  { %1921 = dma.done.wait [#allocation3], 1280  }
  0x47   :  { %1922 = vsyncadd [#allocation3], 4294966016 }
  0x48   :  { %1923 = dma.done.wait [#allocation6], 11264  }
  0x49   :  { %1924 = vsyncadd [#allocation6], 4294956032 }
  0x4a   :  { %1925 = dma.done.wait [#allocation9], 1024  }
  0x4b   :  { %1926 = vsyncadd [#allocation9], 4294966272  ;;  %v1657_v0 = vld [vmem:[#allocation5 + $0x40] sm:$0xff]   ;;  %v1661_v4 = vld [vmem:[#allocation5 + $0x48] sm:$0xff]   ;;  %vm1940_vm0 = vmmov 0   ;;  %s1942_s11 = smov [#allocation10]  }
  0x4c   :  { %v1658_v1 = vld [vmem:[#allocation5] sm:$0xff]   ;;  %1468 = vmatprep.subr.bf16.mxu0 %v1657_v0  ;;  %v1662_v5 = vld [vmem:[#allocation5 + $0x8] sm:$0xff]   ;;  %v1665_v8 = vld [vmem:[#allocation5 + $0x50] sm:$0xff]   ;;  %s1306_s12 = sshll.u32 %s1942_s11, 4  ;;  %s1307_s12 = int_to_ptr.vmem [resolvable:$true] %s1306_s12 }
  0x4d   :  { %v1659_v2 = vld [vmem:[#allocation5 + $0xc0] sm:$0xff]   ;;  %1469 = vmatpush3.bf16.msra.mxu0 %v1658_v1  ;;  %v1663_v6 = vld [vmem:[#allocation5 + $0xc8] sm:$0xff]   ;;  %v1666_v9 = vld [vmem:[#allocation5 + $0x10] sm:$0xff]  }
  0x4e   :  { %v1660_v3 = vld [vmem:[#allocation5 + $0x80] sm:$0xff]   ;;  %1490 = vmatprep.subr.bf16.mxu1 %v1659_v2  ;;  %1470 = vmatprep.subr.bf16.mxu0 %v1661_v4  ;;  %v1664_v7 = vld [vmem:[#allocation5 + $0x88] sm:$0xff]   ;;  %v1667_v10 = vld [vmem:[#allocation5 + $0xd0] sm:$0xff]  }
  0x4f   :  { %1491 = vmatpush3.bf16.msra.mxu1 %v1660_v3  ;;  %v1668_v11 = vld [vmem:[#allocation5 + $0x90] sm:$0xff]   ;;  %v1669_v12 = vld [vmem:[#allocation5 + $0x58] sm:$0xff]   ;;  %v1673_v16 = vld [vmem:[#allocation5 + $0x60] sm:$0xff]  }
  0x50   :  { %1492 = vmatprep.subr.bf16.mxu1 %v1663_v6  ;;  %v1670_v13 = vld [vmem:[#allocation5 + $0x18] sm:$0xff]   ;;  %v1674_v17 = vld [vmem:[#allocation5 + $0x20] sm:$0xff]   ;;  %v1677_v20 = vld [vmem:[#allocation5 + $0x68] sm:$0xff]  }
  0x51   :  { %1471 = vmatpush3.bf16.msra.mxu0 %v1662_v5  ;;  %v1671_v14 = vld [vmem:[#allocation5 + $0xd8] sm:$0xff]   ;;  %v1675_v18 = vld [vmem:[#allocation5 + $0xe0] sm:$0xff]   ;;  %v1678_v21 = vld [vmem:[#allocation5 + $0x28] sm:$0xff]  }
  0x52   :  { %1472 = vmatprep.subr.bf16.mxu0 %v1665_v8  ;;  %v1672_v15 = vld [vmem:[#allocation5 + $0x98] sm:$0xff]   ;;  %v1676_v19 = vld [vmem:[#allocation5 + $0xa0] sm:$0xff]   ;;  %v1679_v22 = vld [vmem:[#allocation5 + $0xe8] sm:$0xff]  }
  0x53   :  { %1493 = vmatpush3.bf16.msra.mxu1 %v1664_v7  ;;  %v1680_v23 = vld [vmem:[#allocation5 + $0xa8] sm:$0xff]   ;;  %v1681_v24 = vld [vmem:[#allocation5 + $0x70] sm:$0xff]   ;;  %v1685_v28 = vld [vmem:[#allocation5 + $0x78] sm:$0xff]  }
  0x54   :  { %1494 = vmatprep.subr.bf16.mxu1 %v1667_v10  ;;  %v1682_v25 = vld [vmem:[#allocation5 + $0x30] sm:$0xff]   ;;  %v1686_v29 = vld [vmem:[#allocation5 + $0x38] sm:$0xff]   ;;  %v1691_v36 = vld [vmem:[#allocation5 + $0x140] sm:$0xff]  }
  0x55   :  { %1473 = vmatpush3.bf16.msra.mxu0 %v1666_v9  ;;  %v1683_v26 = vld [vmem:[#allocation5 + $0xf0] sm:$0xff]   ;;  %v1687_v30 = vld [vmem:[#allocation5 + $0xf8] sm:$0xff]   ;;  %v1695_v39 = vld [vmem:[#allocation5 + $0x100] sm:$0xff]  }
  0x56   :  { %1474 = vmatprep.subr.bf16.mxu0 %v1669_v12  ;;  %v1684_v27 = vld [vmem:[#allocation5 + $0xb0] sm:$0xff]   ;;  %v2057_v32 = vld [vmem:[#allocation2 + $0x28] sm:$0xff]  ;;  %v1696_v40 = vld [vmem:[#allocation5 + $0x1c0] sm:$0xff]  }
  0x57   :  { %1495 = vmatpush3.bf16.msra.mxu1 %v1668_v11  ;;  %v2055_v31 = vld [vmem:[#allocation2] sm:$0xff]  ;;  %v1690_v35 = vld [vmem:[#allocation5 + $0xb8] sm:$0xff]   ;;  %v1697_v41 = vld [vmem:[#allocation5 + $0x180] sm:$0xff]  }
  0x58   :  { %1496 = vmatprep.subr.bf16.mxu1 %v1671_v14  ;;  %v1352_v33 = vcombine.low %v2055_v31, %v2057_v32  ;;  %v1353_v34 = vcombine.high %v2055_v31, %v2057_v32  ;;  %v1692_v37 = vld [vmem:[#allocation2 + $0x8] ss:$40 sps:$4 sm:$0xff]   ;;  %v1694_v38 = vld [vmem:[#allocation2 + $0xc] ss:$40 sps:$4 sm:$0xff]   ;;  %v1698_v42 = vld [vmem:[#allocation5 + $0x148] sm:$0xff]  }
  0x59   :  { %1475 = vmatpush3.bf16.msra.mxu0 %v1670_v13  ;;  %864 = vmatprep.mubr.bf16.mxu1 %v1694_v38  ;;  %v1699_v43 = vld [vmem:[#allocation5 + $0x108] sm:$0xff]   ;;  %v1702_v46 = vld [vmem:[#allocation5 + $0x150] sm:$0xff]   ;;  %v1706_v50 = vld [vmem:[#allocation5 + $0x158] sm:$0xff]  }
  0x5a   :  { %1476 = vmatprep.subr.bf16.mxu0 %v1673_v16  ;;  %823 = vmatprep.mubr.bf16.mxu0 %v1353_v34  ;;  %v1700_v44 = vld [vmem:[#allocation5 + $0x1c8] sm:$0xff]   ;;  %v1703_v47 = vld [vmem:[#allocation5 + $0x110] sm:$0xff]   ;;  %v1707_v51 = vld [vmem:[#allocation5 + $0x118] sm:$0xff]  }
  0x5b   :  { %1497 = vmatpush3.bf16.msra.mxu1 %v1672_v15  ;;  %v1701_v45 = vld [vmem:[#allocation5 + $0x188] sm:$0xff]   ;;  %v1704_v48 = vld [vmem:[#allocation5 + $0x1d0] sm:$0xff]   ;;  %v1708_v52 = vld [vmem:[#allocation5 + $0x1d8] sm:$0xff]  }
  0x5c   :  { %1498 = vmatprep.subr.bf16.mxu1 %v1675_v18  ;;  %v1705_v49 = vld [vmem:[#allocation5 + $0x190] sm:$0xff]   ;;  %v1709_v53 = vld [vmem:[#allocation5 + $0x198] sm:$0xff]   ;;  %v1710_v54 = vld [vmem:[#allocation5 + $0x160] sm:$0xff]  }
  0x5d   :  { %1477 = vmatpush3.bf16.msra.mxu0 %v1674_v17  ;;  %v1711_v55 = vld [vmem:[#allocation5 + $0x120] sm:$0xff]   ;;  %v1714_v58 = vld [vmem:[#allocation5 + $0x168] sm:$0xff]   ;;  %v1718_v62 = vld [vmem:[#allocation5 + $0x170] sm:$0xff]  }
  0x5e   :  { %1478 = vmatprep.subr.bf16.mxu0 %v1677_v20  ;;  %v1712_v56 = vld [vmem:[#allocation5 + $0x1e0] sm:$0xff]   ;;  %v1715_v59 = vld [vmem:[#allocation5 + $0x128] sm:$0xff]   ;;  %v1719_v63 = vld [vmem:[#allocation5 + $0x130] sm:$0xff]  }
  0x5f   :  { %1499 = vmatpush3.bf16.msra.mxu1 %v1676_v19  ;;  %v1713_v57 = vld [vmem:[#allocation5 + $0x1a0] sm:$0xff]   ;;  %v1716_v60 = vld [vmem:[#allocation5 + $0x1e8] sm:$0xff]   ;;  %v1720_v0 = vld [vmem:[#allocation5 + $0x1f0] sm:$0xff]  }
  0x60   :  { %1500 = vmatprep.subr.bf16.mxu1 %v1679_v22  ;;  %v1717_v61 = vld [vmem:[#allocation5 + $0x1a8] sm:$0xff]   ;;  %v1721_v1 = vld [vmem:[#allocation5 + $0x1b0] sm:$0xff]   ;;  %v1722_v2 = vld [vmem:[#allocation5 + $0x178] sm:$0xff]  }
  0x61   :  { %1479 = vmatpush3.bf16.msra.mxu0 %v1678_v21  ;;  %v1723_v3 = vld [vmem:[#allocation5 + $0x138] sm:$0xff]   ;;  %v1725_v5 = vld [vmem:[#allocation2 + $0x10] ss:$40 sps:$4 sm:$0xff]   ;;  %v1727_v6 = vld [vmem:[#allocation2 + $0x14] ss:$40 sps:$4 sm:$0xff]  }
  0x62   :  { %1480 = vmatprep.subr.bf16.mxu0 %v1681_v24  ;;  %v1724_v4 = vld [vmem:[#allocation5 + $0x1f8] sm:$0xff]   ;;  %v1729_v8 = vld [vmem:[#allocation5 + $0x240] sm:$0xff]   ;;  %v1730_v9 = vld [vmem:[#allocation2 + $0x18] ss:$40 sps:$4 sm:$0xff]  }
  0x63   :  { %1501 = vmatpush3.bf16.msra.mxu1 %v1680_v23  ;;  %v1728_v7 = vld [vmem:[#allocation5 + $0x1b8] sm:$0xff]   ;;  %v1732_v10 = vld [vmem:[#allocation2 + $0x1c] ss:$40 sps:$4 sm:$0xff]   ;;  %v1733_v11 = vld [vmem:[#allocation5 + $0x200] sm:$0xff]  }
  0x64   :  { %1502 = vmatprep.subr.bf16.mxu1 %v1683_v26  ;;  %v1734_v12 = vld [vmem:[#allocation5 + $0x248] sm:$0xff]   ;;  %v1736_v14 = vld [vmem:[#allocation5 + $0x250] sm:$0xff]   ;;  %v1738_v16 = vld [vmem:[#allocation5 + $0x258] sm:$0xff]  }
  0x65   :  { %1481 = vmatpush3.bf16.msra.mxu0 %v1682_v25  ;;  %v1735_v13 = vld [vmem:[#allocation5 + $0x208] sm:$0xff]   ;;  %v1737_v15 = vld [vmem:[#allocation5 + $0x210] sm:$0xff]   ;;  %v1739_v17 = vld [vmem:[#allocation5 + $0x218] sm:$0xff]  }
  0x66   :  { %1482 = vmatprep.subr.bf16.mxu0 %v1685_v28  ;;  %v1740_v18 = vld [vmem:[#allocation5 + $0x260] sm:$0xff]   ;;  %v1742_v20 = vld [vmem:[#allocation5 + $0x268] sm:$0xff]   ;;  %v1750_v21 = vld [vmem:[#allocation2 + $0x24] ss:$40 sps:$4 sm:$0xff]  }
  0x67   :  { %1503 = vmatpush3.bf16.msra.mxu1 %v1684_v27  ;;  %v1741_v19 = vld [vmem:[#allocation5 + $0x220] sm:$0xff]   ;;  %v1743_v22 = vld [vmem:[#allocation5 + $0x228] sm:$0xff]   ;;  %v1744_v23 = vld [vmem:[#allocation5 + $0x270] sm:$0xff]  }
  0x68   :  { %1504 = vmatprep.subr.bf16.mxu1 %v1687_v30  ;;  %v1745_v24 = vld [vmem:[#allocation5 + $0x230] sm:$0xff]   ;;  %v1746_v25 = vld [vmem:[#allocation5 + $0x278] sm:$0xff]   ;;  %v1751_v28 = vld [vmem:[#allocation7] sm:$0xff]  }
  0x69   :  { %1483 = vmatpush3.bf16.msra.mxu0 %v1686_v29  ;;  %v1747_v26 = vld [vmem:[#allocation5 + $0x238] sm:$0xff]   ;;  %v1939_v29 = vmov 0.0   ;;  %v1752_v30 = vld [vmem:[#allocation7 + $0x8] sm:$0xff]  }
  0x6a   :  { %1512 = vmatprep.subr.bf16.mxu0 %v1691_v36  ;;  %v1748_v27 = vld [vmem:[#allocation2 + $0x20] ss:$40 sps:$4 sm:$0xff]   ;;  %v1756_v36 = vld [vmem:[#allocation7 + $0x28] sm:$0xff]  }
  0x6b   :  { %1505 = vmatpush3.bf16.msra.mxu1 %v1690_v35  ;;  %v1754_v34 = vld [vmem:[#allocation7 + $0x18] sm:$0xff]   ;;  %v1755_v35 = vld [vmem:[#allocation7 + $0x20] sm:$0xff]  }
  0x6c   :  { %824 = vmatmul.mubr.bf16.vlgmr.msra.gmra.mrb[0].mxu0 %v1352_v33  ;;  %1534 = vmatprep.subr.bf16.mxu1 %v1696_v40  ;;  %v1753_v33 = vld [vmem:[#allocation7 + $0x10] sm:$0xff]   ;;  %v1758_v38 = vld [vmem:[#allocation7 + $0x38] sm:$0xff]   ;;  %v1462_v40 = vunpack.c.h.bf16 %v2055_v31 }
  0x6d   :  { %1513 = vmatpush3.bf16.msra.mxu0 %v1695_v39  ;;  %905 = vmatprep.mubr.bf16.mxu0 %v1727_v6  ;;  %v1461_v39 = vunpack.c.l.bf16 %v2055_v31 }
  0x6e   :  { %865 = vmatmul.mubr.bf16.vlgmr.msra.gmra.mrb[0].mxu1 %v1692_v37  ;;  %1514 = vmatprep.subr.bf16.mxu0 %v1698_v42  ;;  %v1757_v37 = vld [vmem:[#allocation7 + $0x30] sm:$0xff]   ;;  %v1466_v42 = vunpack.c.h.bf16 %v2057_v32 }
  0x6f   :  { %1535 = vmatpush3.bf16.msra.mxu1 %v1697_v41  ;;  %946 = vmatprep.mubr.bf16.mxu1 %v1732_v10  ;;  %v1465_v41 = vunpack.c.l.bf16 %v2057_v32 }
  0x70   :  { %1536 = vmatprep.subr.bf16.mxu1 %v1700_v44  ;;  %v1121_v44 = vld [vmem:[#allocation2 + $0x30] sm:$0xff]  }
  0x71   :  { %1515 = vmatpush3.bf16.msra.mxu0 %v1699_v43  ;;  %v1120_v43 = vld [vmem:[#allocation2 + $0x8] sm:$0xff]  }
  0x72   :  { %1516 = vmatprep.subr.bf16.mxu0 %v1702_v46  ;;  %v1119_v46 = vadd.f32 %v1466_v42, %v1465_v41 }
  0x73   :  { %1537 = vmatpush3.bf16.msra.mxu1 %v1701_v45  ;;  %v1118_v45 = vadd.f32 %v1462_v40, %v1461_v39 }
  0x74   :  { %1538 = vmatprep.subr.bf16.mxu1 %v1704_v48  ;;  %v1123_v48 = vunpack.c.l.bf16 %v1121_v44 }
  0x75   :  { %1517 = vmatpush3.bf16.msra.mxu0 %v1703_v47  ;;  %v1122_v47 = vunpack.c.l.bf16 %v1120_v43 }
  0x76   :  { %1518 = vmatprep.subr.bf16.mxu0 %v1706_v50  ;;  %v1125_v50 = vadd.f32 %v1123_v48, %v1119_v46 }
  0x77   :  { %1539 = vmatpush3.bf16.msra.mxu1 %v1705_v49  ;;  %v1124_v49 = vadd.f32 %v1122_v47, %v1118_v45 }
  0x78   :  { %1540 = vmatprep.subr.bf16.mxu1 %v1708_v52  ;;  %v1129_v52 = vunpack.c.h.bf16 %v1121_v44 }
  0x79   :  { %1519 = vmatpush3.bf16.msra.mxu0 %v1707_v51  ;;  %v1128_v51 = vunpack.c.h.bf16 %v1120_v43 }
  0x7a   :  { %1520 = vmatprep.subr.bf16.mxu0 %v1710_v54  ;;  %v1133_v54 = vld [vmem:[#allocation2 + $0x38] sm:$0xff]  }
  0x7b   :  { %1541 = vmatpush3.bf16.msra.mxu1 %v1709_v53  ;;  %v1132_v53 = vld [vmem:[#allocation2 + $0x10] sm:$0xff]   ;;  %v1135_v31 = vunpack.c.l.bf16 %v1133_v54  ;;  %v1141_v32 = vunpack.c.h.bf16 %v1133_v54 }
  0x7c   :  { %1542 = vmatprep.subr.bf16.mxu1 %v1712_v56  ;;  %v1131_v56 = vadd.f32 %v1129_v52, %v1125_v50 }
  0x7d   :  { %1521 = vmatpush3.bf16.msra.mxu0 %v1711_v55  ;;  %v1130_v55 = vadd.f32 %v1128_v51, %v1124_v49 }
  0x7e   :  { %1522 = vmatprep.subr.bf16.mxu0 %v1714_v58 }
  0x7f   :  { %1543 = vmatpush3.bf16.msra.mxu1 %v1713_v57  ;;  %v1134_v57 = vunpack.c.l.bf16 %v1132_v53 }
  0x80   :  { %1544 = vmatprep.subr.bf16.mxu1 %v1716_v60  ;;  %v1140_v60 = vunpack.c.h.bf16 %v1132_v53 }
  0x81   :  { %1523 = vmatpush3.bf16.msra.mxu0 %v1715_v59  ;;  %v1136_v58 = vadd.f32 %v1134_v57, %v1130_v55  ;;  %v1137_v59 = vadd.f32 %v1135_v31, %v1131_v56 }
  0x82   :  { %1524 = vmatprep.subr.bf16.mxu0 %v1718_v62  ;;  %v1145_v62 = vld [vmem:[#allocation2 + $0x40] sm:$0xff]  }
  0x83   :  { %1545 = vmatpush3.bf16.msra.mxu1 %v1717_v61  ;;  %v1144_v61 = vld [vmem:[#allocation2 + $0x18] sm:$0xff]   ;;  %v1153_v6 = vunpack.c.h.bf16 %v1145_v62 }
  0x84   :  { %1546 = vmatprep.subr.bf16.mxu1 %v1720_v0  ;;  %v1143_v0 = vadd.f32 %v1141_v32, %v1137_v59 }
  0x85   :  { %1525 = vmatpush3.bf16.msra.mxu0 %v1719_v63  ;;  %v1142_v63 = vadd.f32 %v1140_v60, %v1136_v58 }
  0x86   :  { %1526 = vmatprep.subr.bf16.mxu0 %v1722_v2  ;;  %v1147_v2 = vunpack.c.l.bf16 %v1145_v62 }
  0x87   :  { %1547 = vmatpush3.bf16.msra.mxu1 %v1721_v1  ;;  %v1146_v1 = vunpack.c.l.bf16 %v1144_v61 }
  0x88   :  { %1548 = vmatprep.subr.bf16.mxu1 %v1724_v4  ;;  %v1149_v4 = vadd.f32 %v1147_v2, %v1143_v0  ;;  %v1759_v2 = vld [vmem:[#allocation8] sm:$0xff]  }
  0x89   :  { %1527 = vmatpush3.bf16.msra.mxu0 %v1723_v3  ;;  %v1148_v3 = vadd.f32 %v1146_v1, %v1142_v63 }
  0x8a   :  { %1556 = vmatprep.subr.bf16.mxu0 %v1729_v8  ;;  %v1157_v8 = vld [vmem:[#allocation2 + $0x48] sm:$0xff]   ;;  %v1155_v10 = vadd.f32 %v1153_v6, %v1149_v4  ;;  %v1760_v4 = vld [vmem:[#allocation8 + $0x8] sm:$0xff]  }
  0x8b   :  { %1549 = vmatpush3.bf16.msra.mxu1 %v1728_v7  ;;  %v1156_v7 = vld [vmem:[#allocation2 + $0x20] sm:$0xff]   ;;  %v1762_v6 = vld [vmem:[#allocation8 + $0x18] sm:$0xff]  }
  0x8c   :  { %906 = vmatmul.mubr.bf16.vlgmr.msra.gmra.mrb[4].mxu0 %v1725_v5  ;;  %1596 = vmatprep.subr.bf16.mxu1 %v1939_v29  ;;  %v1152_v5 = vunpack.c.h.bf16 %v1144_v61 }
  0x8d   :  { %1557 = vmatpush3.bf16.msra.mxu0 %v1733_v11  ;;  %987 = vmatprep.mubr.bf16.mxu0 %v1750_v21  ;;  %v1158_v11 = vunpack.c.l.bf16 %v1156_v7 }
  0x8e   :  { %947 = vmatmul.mubr.bf16.vlgmr.msra.gmra.mrb[4].mxu1 %v1730_v9  ;;  %1558 = vmatprep.subr.bf16.mxu0 %v1734_v12  ;;  %v1154_v9 = vadd.f32 %v1152_v5, %v1148_v3  ;;  %v1159_v12 = vunpack.c.l.bf16 %v1157_v8  ;;  %v1761_v5 = vld [vmem:[#allocation8 + $0x10] sm:$0xff]  }
  0x8f   :  { %1597 = vmatpush3.bf16.msra.mxu1 %v1751_v28  ;;  %1612 = vmatprep.mubr.msk.bf16.mxu1 %vm1940_vm0, %v1939_v29 }
  0x90   :  { %1598 = vmatprep.subr.bf16.mxu1 %v1939_v29 }
  0x91   :  { %1559 = vmatpush3.bf16.msra.mxu0 %v1735_v13  ;;  %v1160_v13 = vadd.f32 %v1158_v11, %v1154_v9  ;;  %v1765_v9 = vld [vmem:[#allocation8 + $0x30] sm:$0xff]  }
  0x92   :  { %1560 = vmatprep.subr.bf16.mxu0 %v1736_v14  ;;  %v1161_v14 = vadd.f32 %v1159_v12, %v1155_v10  ;;  %v1766_v10 = vld [vmem:[#allocation8 + $0x38] sm:$0xff]  }
  0x93   :  { %1599 = vmatpush3.bf16.msra.mxu1 %v1752_v30 }
  0x94   :  { %1600 = vmatprep.subr.bf16.mxu1 %v1939_v29 }
  0x95   :  { %1561 = vmatpush3.bf16.msra.mxu0 %v1737_v15  ;;  %v1164_v15 = vunpack.c.h.bf16 %v1156_v7  ;;  %v1763_v7 = vld [vmem:[#allocation8 + $0x20] sm:$0xff]  }
  0x96   :  { %1562 = vmatprep.subr.bf16.mxu0 %v1738_v16  ;;  %v1165_v16 = vunpack.c.h.bf16 %v1157_v8  ;;  %v1764_v8 = vld [vmem:[#allocation8 + $0x28] sm:$0xff]  }
  0x97   :  { %1601 = vmatpush3.bf16.msra.mxu1 %v1753_v33 }
  0x98   :  { %1602 = vmatprep.subr.bf16.mxu1 %v1939_v29 }
  0x99   :  { %1563 = vmatpush3.bf16.msra.mxu0 %v1739_v17  ;;  %v1166_v17 = vadd.f32 %v1164_v15, %v1160_v13 }
  0x9a   :  { %1564 = vmatprep.subr.bf16.mxu0 %v1740_v18  ;;  %v1167_v18 = vadd.f32 %v1165_v16, %v1161_v14 }
  0x9b   :  { %1603 = vmatpush3.bf16.msra.mxu1 %v1754_v34 }
  0x9c   :  { %1604 = vmatprep.subr.bf16.mxu1 %v1939_v29 }
  0x9d   :  { %1565 = vmatpush3.bf16.msra.mxu0 %v1741_v19  ;;  %v2078_v19 = vmul.f32 0.1, %v1166_v17 }
  0x9e   :  { %1566 = vmatprep.subr.bf16.mxu0 %v1742_v20  ;;  %v2080_v20 = vmul.f32 0.1, %v1167_v18 }
  0x9f   :  { %1605 = vmatpush3.bf16.msra.mxu1 %v1755_v35  ;;  %1170 = vst [vmem:[#allocation11] sm:$0xff] %v2078_v19 }
  0xa0   :  { %1606 = vmatprep.subr.bf16.mxu1 %v1939_v29  ;;  %v1181_v21 = vpack.c.bf16 %v2080_v20, %v2078_v19  ;;  %1171 = vst [vmem:[#allocation11 + $0x8] sm:$0xff] %v2080_v20 }
  0xa1   :  { %1567 = vmatpush3.bf16.msra.mxu0 %v1743_v22 }
  0xa2   :  { %1568 = vmatprep.subr.bf16.mxu0 %v1744_v23  ;;  %v1351_v23 = vld [vmem:[%s2151_s2] ss:$0 sm:$0xff]  ;;  %s1941_s2 = smov [#allocation11]  }
  0xa3   :  { %1607 = vmatpush3.bf16.msra.mxu1 %v1756_v36  ;;  %s1318_s16 = sshll.u32 %s1941_s2, 4  ;;  %s1319_s16 = int_to_ptr.vmem [resolvable:$true] %s1318_s16 }
  0xa4   :  { %1608 = vmatprep.subr.bf16.mxu1 %v1939_v29  ;;  %s1855_s13 = scalar_lea.vmem %s1319_s16, 256  ;;  %p1860_p5 = scmp.lt.s32.totalorder %s1319_s16, %s1319_s16 }
  0xa5   :  { %1569 = vmatpush3.bf16.msra.mxu0 %v1745_v24  ;;  %p1856_p4 = scmp.ne.s32.totalorder %s1319_s16, %s1855_s13  ;;  %p1861_p6 = scmp.lt.s32.totalorder %s1855_s13, %s1855_s13 }
  0xa6   :  { %1570 = vmatprep.subr.bf16.mxu0 %v1746_v25 }
  0xa7   :  { %1609 = vmatpush3.bf16.msra.mxu1 %v1757_v37  ;;  %p1862_p7 = por %p1861_p6, %p1860_p5 }
  0xa8   :  { %1610 = vmatprep.subr.bf16.mxu1 %v1939_v29 }
  0xa9   :  { %1571 = vmatpush3.bf16.msra.mxu0 %v1747_v26  ;;  %p1863_p8 = pnand %p1862_p7, %p1856_p4 }
  0xab   :  { %1611 = vmatpush3.bf16.msra.mxu1 %v1758_v38 }
  0xac   :  { %988 = vmatmul.mubr.bf16.vlgmr.msra.gmra.mrb[8].mxu0 %v1748_v27  ;;  %1616 = vmatprep.subr.bf16.mxu1 %v1939_v29 }
 0x13f   :  { %v1484_v22 = vpop.f32.mrb[0].mxu0 }
 0x140   :  { %v1485_v24 = vpop.f32.mrb[1].mxu0 }
 0x141   :  { %v1486_v25 = vadd.f32 %v1485_v24, %v1484_v22  ;;  %v1487_v26 = vpop.f32.mrb[2].mxu0  ;;  %v1506_v27 = vpop.f32.mrb[0].mxu1 }
 0x142   :  { %v1488_v28 = vpop.f32.mrb[3].mxu0  ;;  %v1507_v30 = vpop.f32.mrb[1].mxu1 }
 0x143   :  { %v826_v33 = vadd.f32 %v1486_v25, %v1351_v23  ;;  %v1489_v34 = vadd.f32 %v1488_v28, %v1487_v26  ;;  %v1508_v35 = vadd.f32 %v1507_v30, %v1506_v27  ;;  %v1509_v36 = vpop.f32.mrb[2].mxu1 }
 0x144   :  { %v1510_v37 = vpop.f32.mrb[3].mxu1 }
 0x145   :  { %v829_v38 = vadd.f32 %v1489_v34, %v1351_v23  ;;  %v867_v39 = vadd.f32 %v1508_v35, %v826_v33  ;;  %v1511_v40 = vadd.f32 %v1510_v37, %v1509_v36 }
 0x147   :  { %v870_v41 = vadd.f32 %v1511_v40, %v829_v38 }
 0x15f   :  { %v1528_v42 = vpop.f32.mrb[4].mxu0 }
 0x160   :  { %v1529_v43 = vpop.f32.mrb[5].mxu0 }
 0x161   :  { %v1530_v44 = vadd.f32 %v1529_v43, %v1528_v42  ;;  %v1531_v45 = vpop.f32.mrb[6].mxu0  ;;  %v1550_v46 = vpop.f32.mrb[4].mxu1 }
 0x162   :  { %v1532_v47 = vpop.f32.mrb[7].mxu0  ;;  %v1551_v50 = vpop.f32.mrb[5].mxu1 }
 0x163   :  { %v908_v48 = vadd.f32 %v1530_v44, %v867_v39  ;;  %v1533_v49 = vadd.f32 %v1532_v47, %v1531_v45  ;;  %v1552_v51 = vadd.f32 %v1551_v50, %v1550_v46  ;;  %v1553_v52 = vpop.f32.mrb[6].mxu1 }
 0x164   :  { %v1554_v54 = vpop.f32.mrb[7].mxu1 }
 0x165   :  { %v911_v53 = vadd.f32 %v1533_v49, %v870_v41  ;;  %v949_v55 = vadd.f32 %v1552_v51, %v908_v48  ;;  %v1555_v56 = vadd.f32 %v1554_v54, %v1553_v52 }
 0x167   :  { %v952_v57 = vadd.f32 %v1555_v56, %v911_v53 }
 0x17f   :  { %v1572_v31 = vpop.f32.mrb[8].mxu0 }
 0x180   :  { %v1573_v58 = vpop.f32.mrb[9].mxu0 }
 0x181   :  { %v1574_v59 = vadd.f32 %v1573_v58, %v1572_v31  ;;  %v1575_v60 = vpop.f32.mrb[10].mxu0 }
 0x182   :  { %v1576_v32 = vpop.f32.mrb[11].mxu0 }
 0x183   :  { %v990_v61 = vadd.f32 %v1574_v59, %v949_v55  ;;  %v1577_v62 = vadd.f32 %v1576_v32, %v1575_v60 }
 0x185   :  { %v996_v63 = vmax.f32 %v990_v61, 0.0  ;;  %v993_v0 = vadd.f32 %v1577_v62, %v952_v57 }
 0x187   :  { %998 = vst [vmem:[#allocation10] sm:$0xff] %v996_v63  ;;  %v997_v1 = vmax.f32 %v993_v0, 0.0 }
 0x189   :  { %999 = vst [vmem:[#allocation10 + $0x8] sm:$0xff] %v997_v1  ;;  %v1000_v3 = vpack.c.bf16 %v997_v1, %v996_v63 }
 0x18b   :  { %1613 = vmatmul.mubr.bf16.vlgmr.msra.gmra.mrb[8].mxu1 %v1000_v3 }
 0x18c   :  { %1617 = vmatpush3.bf16.msra.mxu1 %v1759_v2  ;;  %1632 = vmatprep.mubr.msk.bf16.mxu1 %vm1940_vm0, %v1939_v29 }
 0x18d   :  { %1618 = vmatprep.subr.bf16.mxu1 %v1939_v29 }
 0x190   :  { %1619 = vmatpush3.bf16.msra.mxu1 %v1760_v4 }
 0x191   :  { %1620 = vmatprep.subr.bf16.mxu1 %v1939_v29 }
 0x194   :  { %1621 = vmatpush3.bf16.msra.mxu1 %v1761_v5 }
 0x195   :  { %1622 = vmatprep.subr.bf16.mxu1 %v1939_v29 }
 0x198   :  { %1623 = vmatpush3.bf16.msra.mxu1 %v1762_v6 }
 0x199   :  { %1624 = vmatprep.subr.bf16.mxu1 %v1939_v29 }
 0x19c   :  { %1625 = vmatpush3.bf16.msra.mxu1 %v1763_v7 }
 0x19d   :  { %1626 = vmatprep.subr.bf16.mxu1 %v1939_v29 }
 0x1a0   :  { %1627 = vmatpush3.bf16.msra.mxu1 %v1764_v8 }
 0x1a1   :  { %1628 = vmatprep.subr.bf16.mxu1 %v1939_v29 }
 0x1a4   :  { %1629 = vmatpush3.bf16.msra.mxu1 %v1765_v9 }
 0x1a5   :  { %1630 = vmatprep.subr.bf16.mxu1 %v1939_v29 }
 0x1a8   :  { %1631 = vmatpush3.bf16.msra.mxu1 %v1766_v10 }
 0x1ab   :  { %1633 = vmatmul.mubr.bf16.vlgmr.msra.gmra.mrb[8].mxu1 %v1181_v21 }
 0x1ac   :  { %1866 = shalt.err (!%p1863_p8)
}
 0x1ad   :  { %s1867_s18 = scalar_lea.hbm %s2156_s7, 256 }
 0x1ae   :  { %p1868_p9 = scmp.ne.s32.totalorder %s2156_s7, %s1867_s18  ;;  %p1871_p10 = scmp.lt.u32.totalorder %s1867_s18, %s2156_s7 }
 0x1b0   :  { %p1873_p11 = pnand %p1871_p10, %p1868_p9 }
 0x1b2   :  { %1876 = shalt.err (!%p1873_p11)
}
 0x1b3   :  { %s1943_s0 = smov 128   ;;  %s1944_s20 = smov 8  }
 0x1b4   :  { %1324 = dma.vmem_to_hbm [thread:$0]  %s1319_s16, 256, %s2156_s7, [#allocation12], %s1943_s0, %s1943_s0, %s1944_s20  }
 0x1b5   :  { %s1877_s26 = scalar_lea.vmem %s1307_s12, 256  ;;  %p1882_p13 = scmp.lt.s32.totalorder %s1307_s12, %s1307_s12 }
 0x1b6   :  { %p1878_p12 = scmp.ne.s32.totalorder %s1307_s12, %s1877_s26  ;;  %p1883_p0 = scmp.lt.s32.totalorder %s1877_s26, %s1877_s26 }
 0x1b8   :  { %p1884_p1 = por %p1883_p0, %p1882_p13 }
 0x1ba   :  { %p1885_p2 = pnand %p1884_p1, %p1878_p12 }
 0x1bc   :  { %1888 = shalt.err (!%p1885_p2)
}
 0x1bd   :  { %s1889_s1 = scalar_lea.hbm %s2155_s6, 256 }
 0x1be   :  { %p1890_p3 = scmp.ne.s32.totalorder %s2155_s6, %s1889_s1  ;;  %p1893_p4 = scmp.lt.u32.totalorder %s1889_s1, %s2155_s6 }
 0x1c0   :  { %p1895_p5 = pnand %p1893_p4, %p1890_p3 }
 0x1c2   :  { %1898 = shalt.err (!%p1895_p5)
}
 0x1c3   :  { %1312 = dma.vmem_to_hbm [thread:$0]  %s1307_s12, 256, %s2155_s6, [#allocation4], %s1943_s0, %s1943_s0, %s1944_s20  }
 0x1c4   :  { %v1450_v29 = vld [vmem:[%s2154_s5] ss:$0 sm:$0xff]  ;;  %s1945_s2 = smov [#allocation13]  }
 0x1c5   :  { %s1330_s16 = sshll.u32 %s1945_s2, 4  ;;  %s1331_s16 = int_to_ptr.vmem [resolvable:$true] %s1330_s16 }
 0x1c6   :  { %s1899_s11 = scalar_lea.vmem %s1331_s16, 256  ;;  %p1904_p7 = scmp.lt.s32.totalorder %s1331_s16, %s1331_s16 }
 0x1c7   :  { %p1900_p6 = scmp.ne.s32.totalorder %s1331_s16, %s1899_s11  ;;  %p1905_p8 = scmp.lt.s32.totalorder %s1899_s11, %s1899_s11 }
 0x1c9   :  { %p1906_p9 = por %p1905_p8, %p1904_p7 }
 0x1cb   :  { %p1907_p10 = pnand %p1906_p9, %p1900_p6 }
 0x27e   :  { %v1280_v11 = vpop.f32.mrb[8].mxu1 }
 0x27f   :  { %v1636_v12 = vadd.f32 %v1450_v29, %v1280_v11  ;;  %v1634_v13 = vpop.f32.mrb[9].mxu1 }
 0x280   :  { %v1283_v14 = vpop.f32.mrb[10].mxu1 }
 0x281   :  { %1289 = vst [vmem:[#allocation13] sm:$0xff] %v1636_v12  ;;  %v1637_v15 = vadd.f32 %v1450_v29, %v1283_v14  ;;  %v1635_v16 = vpop.f32.mrb[11].mxu1 }
 0x283   :  { %1290 = vst [vmem:[#allocation13 + $0x8] sm:$0xff] %v1637_v15 }
 0x284   :  { %1910 = shalt.err (!%p1907_p10)
}
 0x285   :  { %s1911_s12 = scalar_lea.hbm %s2157_s8, 256 }
 0x286   :  { %p1912_p11 = scmp.ne.s32.totalorder %s2157_s8, %s1911_s12  ;;  %p1915_p12 = scmp.lt.u32.totalorder %s1911_s12, %s2157_s8 }
 0x288   :  { %p1917_p13 = pnand %p1915_p12, %p1912_p11 }
 0x28a   :  { %1920 = shalt.err (!%p1917_p13)
}
 0x28b   :  { %1336 = dma.vmem_to_hbm [thread:$0]  %s1331_s16, 256, %s2157_s8, [#allocation12], %s1943_s0, %s1943_s0, %s1944_s20  }
 0x28c   :  { %1927 = dma.done.wait [#allocation4], 256  }
 0x28d   :  { %1928 = vsyncadd [#allocation4], 4294967040 }
 0x28e   :  { %1929 = dma.done.wait [#allocation12], 512  }
 0x28f   :  { %1930 = vsyncadd [#allocation12], 4294966784 }
 0x290   :  { %1346 = vsyncpa [#allocation3], 1 }
 0x291   :  { %1347 = vsyncpa [#allocation6], 1 }
 0x292   :  { %1348 = vsyncpa [#allocation9], 1 }
 0x293   :  { %1349 = vsyncpa [#allocation4], 1 }
 0x294   :  { %1350 = vsyncpa [#allocation12], 1 }

</bundles_post_ra>
